<compile_context>
chip_gen: v6e
topology: v6e:2x2x1
jax: 0.10.0
libtpu: 0.0.40
codegen_flags: <defaults>
</compile_context>

<pallas_src>
import functools

import jax
import jax.numpy as jnp
from jax.experimental import pallas as pl
from jax.experimental.pallas import tpu as pltpu


def _round_up(x, m):
    return (x + m - 1) // m * m


def _num_tensorcores():
    """2 on megacore chips (v4 / v5p / v7x), else 1 (v5e / v6e)."""
    try:
        kind = jax.devices()[0].device_kind.lower()
    except Exception:
        return 1
    if "v7" in kind or "v5p" in kind or "v4" in kind:
        return 2
    return 1


def _nll_kernel(pred_ref, tgt_ref, expand_ref, cls_ref, w_ref,
                num_ref, den_ref, *, n_rows):
    i = pl.program_id(0)          # core (parallel) axis
    j = pl.program_id(1)          # sequential reduction axis
    n_j = pl.num_programs(1)

    # Init per-core accumulators (output blocks stay resident across j).
    @pl.when(j == 0)
    def _():
        num_ref[...] = jnp.zeros(num_ref.shape, num_ref.dtype)
        den_ref[...] = jnp.zeros(den_ref.shape, den_ref.dtype)

    pred = pred_ref[...].astype(jnp.float32)   # (TM, 128) lane-dense log-probs
    tgt = tgt_ref[...]                         # (TM, L)   int32 targets
    expand = expand_ref[...]                   # (L, 128)  f32 0/1 expand matrix
    cls_lane = cls_ref[...]                    # (1, 128)  f32, lane % c_pad
    w_lane = w_ref[...]                        # (1, 128)  f32, w[lane % c_pad]

    tm, _ = tgt.shape

    # Fold row validity into the targets in the small (TM, L) domain: rows past
    # the real end of the flat (M, 128) array (grid remainder and clamped
    # out-of-range blocks on the second core) get target -1, which matches no
    # lane class below, so garbage pred rows are dropped by the select.
    blk = i * n_j + j
    row_id = jax.lax.broadcasted_iota(jnp.int32, (tm, 1), 0) + blk * tm
    tgt = jnp.where(row_id < n_rows, tgt, -1)

    # Expand per-point targets to per-lane values with a tiny 0/1 matmul on the
    # otherwise-idle MXU:  t_exp[r, lane] = tgt[r, lane // c_pad].
    t_exp = jnp.dot(tgt.astype(jnp.float32), expand,
                    preferred_element_type=jnp.float32)        # (TM, 128)

    sel = t_exp == cls_lane                                    # (TM, 128)

    # Select-based masking: non-selected lanes (incl. -inf / NaN garbage) are
    # dropped by the select, never multiplied by zero.
    num_elem = jnp.where(sel, pred * w_lane, 0.0)              # (TM, 128)
    den_elem = jnp.where(sel, w_lane, 0.0)                     # (TM, 128)

    # Per-lane partial sums only (cross-lane reduce happens in the wrapper).
    num_ref[...] += jnp.sum(num_elem, axis=0).reshape(1, 1, 128)
    den_ref[...] += jnp.sum(den_elem, axis=0).reshape(1, 1, 128)


def nll_loss_pallas(pred, target, weight, *, tile_rows=None, num_cores=None):
    """Weighted mean NLL loss.

    pred:   (N, C) log-probabilities, float32 or bfloat16
    target: (N,)   integer class indices in [0, C)
    weight: (C,)   per-class weights
    """
    n, c = pred.shape
    if c > 128:
        # TODO(synk): add a multi-row-per-point path for C > 128 (not needed
        # for the 13-class PointNet2 sem-seg model).
        raise NotImplementedError("nll_loss_pallas supports up to 128 classes")

    target = target.astype(jnp.int32)
    weight = weight.astype(jnp.float32)

    # Round the class axis up to a divisor of 128 so each lane-dense flat row
    # packs a whole number of points, and pad the point axis to a multiple of
    # the points-per-row.  One combined pad pass; padded points get target -1
    # (select nothing), padded classes have weight 0 and are never selected.
    c_pad = max(1, pl.next_power_of_2(c))
    l = 128 // c_pad                       # points per lane-dense row
    c_extra = c_pad - c
    n_extra = (-n) % l

    if c_extra or n_extra:
        # TODO(synk): fuse this reduction into the producing log_softmax kernel
        # (emit the padded lane-dense layout there) to avoid this extra HBM
        # pass over pred and the (N, C) round-trip entirely.
        pred = jnp.pad(pred, ((0, n_extra), (0, c_extra)))
    if n_extra:
        target = jnp.pad(target, (0, n_extra), constant_values=-1)
    if c_extra:
        weight = jnp.pad(weight, (0, c_extra))

    m = (n + n_extra) // l                 # number of lane-dense rows
    pred_flat = pred.reshape(m, 128)       # free reshape, fully lane-dense
    tgt_pack = target.reshape(m, l)        # L targets per row

    # Tiny resident constant tables (computed once, constant index_map).
    lane = jnp.arange(128, dtype=jnp.int32)
    expand = (lane[None, :] // c_pad
              == jnp.arange(l, dtype=jnp.int32)[:, None]).astype(jnp.float32)
    cls_lane = (lane % c_pad).astype(jnp.float32).reshape(1, 128)
    w_lane = jnp.tile(weight, l).reshape(1, 128)

    # ~4 MiB of pred per grid step so per-step overhead stays small; bf16 gets
    # twice the rows.  Double-buffered pred + the (TM,128) f32 matmul result
    # stays well under the 40 MiB scoped-VMEM limit requested below.
    if tile_rows is None:
        tile_rows = 8192 if pred.dtype == jnp.float32 else 16384

    tm = min(_round_up(tile_rows, 16), _round_up(m, 16))
    nb = pl.cdiv(m, tm)                    # real row-blocks
    if num_cores is None:
        num_cores = _num_tensorcores()
    # Never emit fully-masked duplicate blocks (single-TC chips, tiny inputs).
    num_cores = max(1, min(num_cores, nb))
    n_j = pl.cdiv(nb, num_cores)           # sequential steps per core

    def row_block(i, j):
        # Clamp so a core's trailing (empty) step re-reads the last real block;
        # its contribution is zeroed by the in-kernel row-validity fold.
        return (jnp.minimum(i * n_j + j, nb - 1), 0)

    const_block = lambda i, j: (0, 0)

    kernel = functools.partial(_nll_kernel, n_rows=m)

    num_parts, den_parts = pl.pallas_call(
        kernel,
        out_shape=(jax.ShapeDtypeStruct((num_cores, 1, 128), jnp.float32),
                   jax.ShapeDtypeStruct((num_cores, 1, 128), jnp.float32)),
        grid_spec=pltpu.PrefetchScalarGridSpec(
            num_scalar_prefetch=0,
            grid=(num_cores, n_j),
            in_specs=[
                pl.BlockSpec((tm, 128), row_block),      # lane-dense pred
                pl.BlockSpec((tm, l), row_block),        # packed targets
                pl.BlockSpec((l, 128), const_block),     # target-expand matrix
                pl.BlockSpec((1, 128), const_block),     # per-lane class ids
                pl.BlockSpec((1, 128), const_block),     # per-lane weights
            ],
            out_specs=[
                pl.BlockSpec((1, 1, 128), lambda i, j: (i, 0, 0)),  # core num
                pl.BlockSpec((1, 1, 128), lambda i, j: (i, 0, 0)),  # core den
            ],
        ),
        compiler_params=pltpu.CompilerParams(
            dimension_semantics=("parallel", "arbitrary"),
            vmem_limit_bytes=40 * 1024 * 1024),
    )(pred_flat, tgt_pack, expand, cls_lane, w_lane)

    # Tiny cross-core / cross-lane combine + division in plain JAX.
    return -(jnp.sum(num_parts) / jnp.sum(den_parts))


def get_loss_forward(pred, target, trans_feat, weight):
    # trans_feat is ignored by the reference module's forward.
    del trans_feat
    return nll_loss_pallas(pred, target, weight)


def _ref_loss(pred, target, weight):
    pred = pred.astype(jnp.float32)
    weight = weight.astype(jnp.float32)
    w_t = weight[target]
    n = pred.shape[0]
    return -jnp.sum(w_t * pred[jnp.arange(n), target]) / jnp.sum(w_t)


if __name__ == "__main__":
    key = jax.random.PRNGKey(0)
    k1, k2, k3, k4, k5, k6 = jax.random.split(key, 6)

    # --- Main check: shapes consistent with the sem-seg module -------------
    # batch=2, npoints=128, 13 semantic classes -> pred is (256, 13) log-probs.
    N, C = 256, 13
    logits = jax.random.normal(k1, (N, C), dtype=jnp.float32)
    pred = jax.nn.log_softmax(logits, axis=-1)
    target = jax.random.randint(k2, (N,), 0, C, dtype=jnp.int32)
    weight = jax.random.uniform(k3, (C,), dtype=jnp.float32,
                                minval=0.5, maxval=1.5)
    trans_feat = jax.random.normal(k4, (2, 64, 64), dtype=jnp.float32)  # unused

    loss = get_loss_forward(pred, target, trans_feat, weight)
    loss = jax.block_until_ready(loss)
    ref = _ref_loss(pred, target, weight)
    assert jnp.allclose(loss, ref, rtol=1e-5, atol=1e-5), (loss, ref)

    # --- Secondary check: multi-block grid, remainder masking, bf16 pred,
    # forced 2-way core split with a clamped (fully-masked) trailing block ----
    N2, C2 = 3000, 13
    logits2 = jax.random.normal(k5, (N2, C2), dtype=jnp.float32)
    pred2 = jax.nn.log_softmax(logits2, axis=-1).astype(jnp.bfloat16)
    target2 = jax.random.randint(k6, (N2,), 0, C2, dtype=jnp.int32)

    loss2 = nll_loss_pallas(pred2, target2, weight, tile_rows=128, num_cores=2)
    loss2 = jax.block_until_ready(loss2)
    ref2 = _ref_loss(pred2, target2, weight)
    assert jnp.allclose(loss2, ref2, rtol=1e-4, atol=1e-4), (loss2, ref2)

    print("KERNEL_OK")
</pallas_src>

<mosaic_0001>
module attributes {stable_mosaic.version = 11 : i64} {
  func.func @_nll_kernel(%arg0: i32, %arg1: i32, %arg2: memref<32x128xf32, #tpu.memory_space<vmem>>, %arg3: memref<32x8xi32, #tpu.memory_space<vmem>>, %arg4: memref<8x128xf32, #tpu.memory_space<vmem>>, %arg5: memref<1x128xf32, #tpu.memory_space<vmem>>, %arg6: memref<1x128xf32, #tpu.memory_space<vmem>>, %arg7: memref<1x1x128xf32, #tpu.memory_space<vmem>>, %arg8: memref<1x1x128xf32, #tpu.memory_space<vmem>>) attributes {dimension_semantics = [#tpu.dimension_semantics<parallel>, #tpu.dimension_semantics<arbitrary>], iteration_bounds = array<i64: 1, 1>, scalar_prefetch = 0 : i64, scratch_operands = 0 : i64, tpu.core_type = #tpu.core_type<tc>, window_params = [{transform_indices = @transform_0, window_bounds = array<i64: 32, 128>}, {transform_indices = @transform_1, window_bounds = array<i64: 32, 8>}, {pipeline_mode = #tpu.pipeline_mode<synchronous>, transform_indices = @transform_2, window_bounds = array<i64: 8, 128>}, {pipeline_mode = #tpu.pipeline_mode<synchronous>, transform_indices = @transform_3, window_bounds = array<i64: 1, 128>}, {pipeline_mode = #tpu.pipeline_mode<synchronous>, transform_indices = @transform_4, window_bounds = array<i64: 1, 128>}, {transform_indices = @transform_5, window_bounds = array<i64: 1, 1, 128>}, {transform_indices = @transform_6, window_bounds = array<i64: 1, 1, 128>}]} {
    %c0_i32 = arith.constant 0 : i32
    %0 = arith.cmpi eq, %arg1, %c0_i32 : i32
    %1 = arith.extui %0 : i1 to i32
    %c0_i32_0 = arith.constant 0 : i32
    %2 = arith.cmpi ne, %1, %c0_i32_0 : i32
    scf.if %2 {
      %cst_27 = arith.constant 0.000000e+00 : f32
      %42 = vector.broadcast %cst_27 : f32 to vector<1x1x128xf32>
      %c0_28 = arith.constant 0 : index
      %c0_29 = arith.constant 0 : index
      %c0_30 = arith.constant 0 : index
      %43 = vector.load %arg7[%c0_28, %c0_29, %c0_30] : memref<1x1x128xf32, #tpu.memory_space<vmem>>, vector<1x1x128xf32>
      tpu.vector_store %arg7[%c0_28, %c0_29, %c0_30], %42 {strides = array<i32>} : memref<1x1x128xf32, #tpu.memory_space<vmem>>, vector<1x1x128xf32>,
      %cst_31 = arith.constant 0.000000e+00 : f32
      %44 = vector.broadcast %cst_31 : f32 to vector<1x1x128xf32>
      %c0_32 = arith.constant 0 : index
      %c0_33 = arith.constant 0 : index
      %c0_34 = arith.constant 0 : index
      %45 = vector.load %arg8[%c0_32, %c0_33, %c0_34] : memref<1x1x128xf32, #tpu.memory_space<vmem>>, vector<1x1x128xf32>
      tpu.vector_store %arg8[%c0_32, %c0_33, %c0_34], %44 {strides = array<i32>} : memref<1x1x128xf32, #tpu.memory_space<vmem>>, vector<1x1x128xf32>,
    } else {
    }
    %c0 = arith.constant 0 : index
    %c0_1 = arith.constant 0 : index
    %3 = vector.load %arg2[%c0, %c0_1] : memref<32x128xf32, #tpu.memory_space<vmem>>, vector<32x128xf32>
    %c0_2 = arith.constant 0 : index
    %c0_3 = arith.constant 0 : index
    %4 = vector.load %arg3[%c0_2, %c0_3] : memref<32x8xi32, #tpu.memory_space<vmem>>, vector<32x8xi32>
    %c0_4 = arith.constant 0 : index
    %c0_5 = arith.constant 0 : index
    %5 = vector.load %arg4[%c0_4, %c0_5] : memref<8x128xf32, #tpu.memory_space<vmem>>, vector<8x128xf32>
    %c0_6 = arith.constant 0 : index
    %c0_7 = arith.constant 0 : index
    %6 = vector.load %arg5[%c0_6, %c0_7] : memref<1x128xf32, #tpu.memory_space<vmem>>, vector<1x128xf32>
    %c0_8 = arith.constant 0 : index
    %c0_9 = arith.constant 0 : index
    %7 = vector.load %arg6[%c0_8, %c0_9] : memref<1x128xf32, #tpu.memory_space<vmem>>, vector<1x128xf32>
    %c1_i32 = arith.constant 1 : i32
    %8 = arith.muli %arg0, %c1_i32 : i32
    %9 = arith.addi %8, %arg1 : i32
    %10 = tpu.iota {dimensions = array<i32: 0>} : vector<32x1xi32>
    %c32_i32 = arith.constant 32 : i32
    %11 = arith.muli %9, %c32_i32 : i32
    %12 = vector.broadcast %11 : i32 to vector<32x1xi32>
    %13 = arith.addi %10, %12 : vector<32x1xi32>
    %c32_i32_10 = arith.constant 32 : i32
    %14 = vector.broadcast %c32_i32_10 : i32 to vector<32x1xi32>
    %15 = arith.cmpi slt, %13, %14 : vector<32x1xi32>
    %c-1_i32 = arith.constant -1 : i32
    %16 = vector.shape_cast %15 : vector<32x1xi1> to vector<32x1xi1>
    %17 = vector.broadcast %16 : vector<32x1xi1> to vector<32x8xi1>
    %18 = vector.broadcast %c-1_i32 : i32 to vector<32x8xi32>
    %19 = arith.select %17, %4, %18 : vector<32x8xi1>, vector<32x8xi32>
    %20 = arith.sitofp %19 : vector<32x8xi32> to vector<32x8xf32>
    %cst = arith.constant dense<0.000000e+00> : vector<32x128xf32>
    %21 = tpu.matmul %20, %5, %cst {dimension_numbers = #tpu.dot_dimension_numbers<[1], [0], [0], [1], [0, 0, 1, 1], [], []>} : vector<32x8xf32>, vector<8x128xf32>, vector<32x128xf32> -> vector<32x128xf32>
    %22 = vector.broadcast %6 : vector<1x128xf32> to vector<32x128xf32>
    %23 = arith.cmpf oeq, %21, %22 : vector<32x128xf32>
    %24 = vector.broadcast %7 : vector<1x128xf32> to vector<32x128xf32>
    %25 = arith.mulf %3, %24 : vector<32x128xf32>
    %cst_11 = arith.constant 0.000000e+00 : f32
    %26 = vector.broadcast %cst_11 : f32 to vector<32x128xf32>
    %27 = arith.select %23, %25, %26 : vector<32x128xi1>, vector<32x128xf32>
    %cst_12 = arith.constant 0.000000e+00 : f32
    %28 = vector.shape_cast %7 : vector<1x128xf32> to vector<1x128xf32>
    %29 = vector.broadcast %28 : vector<1x128xf32> to vector<32x128xf32>
    %30 = vector.broadcast %cst_12 : f32 to vector<32x128xf32>
    %31 = arith.select %23, %29, %30 : vector<32x128xi1>, vector<32x128xf32>
    %c0_13 = arith.constant 0 : index
    %c0_14 = arith.constant 0 : index
    %c0_15 = arith.constant 0 : index
    %32 = vector.load %arg7[%c0_13, %c0_14, %c0_15] : memref<1x1x128xf32, #tpu.memory_space<vmem>>, vector<1x1x128xf32>
    %cst_16 = arith.constant dense<0.000000e+00> : vector<128xf32>
    %33 = vector.multi_reduction <add>, %27, %cst_16 [0] : vector<32x128xf32> to vector<128xf32>
    %34 = vector.shape_cast %33 : vector<128xf32> to vector<1x1x128xf32>
    %35 = arith.addf %32, %34 : vector<1x1x128xf32>
    %c0_17 = arith.constant 0 : index
    %c0_18 = arith.constant 0 : index
    %c0_19 = arith.constant 0 : index
    %36 = vector.load %arg7[%c0_17, %c0_18, %c0_19] : memref<1x1x128xf32, #tpu.memory_space<vmem>>, vector<1x1x128xf32>
    tpu.vector_store %arg7[%c0_17, %c0_18, %c0_19], %35 {strides = array<i32>} : memref<1x1x128xf32, #tpu.memory_space<vmem>>, vector<1x1x128xf32>,
    %c0_20 = arith.constant 0 : index
    %c0_21 = arith.constant 0 : index
    %c0_22 = arith.constant 0 : index
    %37 = vector.load %arg8[%c0_20, %c0_21, %c0_22] : memref<1x1x128xf32, #tpu.memory_space<vmem>>, vector<1x1x128xf32>
    %cst_23 = arith.constant dense<0.000000e+00> : vector<128xf32>
    %38 = vector.multi_reduction <add>, %31, %cst_23 [0] : vector<32x128xf32> to vector<128xf32>
    %39 = vector.shape_cast %38 : vector<128xf32> to vector<1x1x128xf32>
    %40 = arith.addf %37, %39 : vector<1x1x128xf32>
    %c0_24 = arith.constant 0 : index
    %c0_25 = arith.constant 0 : index
    %c0_26 = arith.constant 0 : index
    %41 = vector.load %arg8[%c0_24, %c0_25, %c0_26] : memref<1x1x128xf32, #tpu.memory_space<vmem>>, vector<1x1x128xf32>
    tpu.vector_store %arg8[%c0_24, %c0_25, %c0_26], %40 {strides = array<i32>} : memref<1x1x128xf32, #tpu.memory_space<vmem>>, vector<1x1x128xf32>,
    return
  }
  func.func @transform_0(%arg0: i32, %arg1: i32) -> (i32, i32) {
    %c1_i32 = arith.constant 1 : i32
    %0 = arith.muli %arg0, %c1_i32 : i32
    %1 = arith.addi %0, %arg1 : i32
    %c0_i32 = arith.constant 0 : i32
    %2 = arith.minsi %1, %c0_i32 : i32
    %c0_i32_0 = arith.constant 0 : i32
    %c0_i32_1 = arith.constant 0 : i32
    return %2, %c0_i32_0 : i32, i32
  }
  func.func @transform_1(%arg0: i32, %arg1: i32) -> (i32, i32) {
    %c1_i32 = arith.constant 1 : i32
    %0 = arith.muli %arg0, %c1_i32 : i32
    %1 = arith.addi %0, %arg1 : i32
    %c0_i32 = arith.constant 0 : i32
    %2 = arith.minsi %1, %c0_i32 : i32
    %c0_i32_0 = arith.constant 0 : i32
    %c0_i32_1 = arith.constant 0 : i32
    return %2, %c0_i32_0 : i32, i32
  }
  func.func @transform_2(%arg0: i32, %arg1: i32) -> (i32, i32) {
    %c0_i32 = arith.constant 0 : i32
    %c0_i32_0 = arith.constant 0 : i32
    %c0_i32_1 = arith.constant 0 : i32
    return %c0_i32, %c0_i32_0 : i32, i32
  }
  func.func @transform_3(%arg0: i32, %arg1: i32) -> (i32, i32) {
    %c0_i32 = arith.constant 0 : i32
    %c0_i32_0 = arith.constant 0 : i32
    %c0_i32_1 = arith.constant 0 : i32
    return %c0_i32, %c0_i32_0 : i32, i32
  }
  func.func @transform_4(%arg0: i32, %arg1: i32) -> (i32, i32) {
    %c0_i32 = arith.constant 0 : i32
    %c0_i32_0 = arith.constant 0 : i32
    %c0_i32_1 = arith.constant 0 : i32
    return %c0_i32, %c0_i32_0 : i32, i32
  }
  func.func @transform_5(%arg0: i32, %arg1: i32) -> (i32, i32, i32) {
    %c0_i32 = arith.constant 0 : i32
    %c0_i32_0 = arith.constant 0 : i32
    %c0_i32_1 = arith.constant 0 : i32
    return %arg0, %c0_i32, %c0_i32_0 : i32, i32, i32
  }
  func.func @transform_6(%arg0: i32, %arg1: i32) -> (i32, i32, i32) {
    %c0_i32 = arith.constant 0 : i32
    %c0_i32_0 = arith.constant 0 : i32
    %c0_i32_1 = arith.constant 0 : i32
    return %arg0, %c0_i32, %c0_i32_0 : i32, i32, i32
  }
}

</mosaic_0001>

<bundles_post_ra>
// kernel: tpu_custom_call.1
= control target key start
LH: loop header
LB: loop body
LE: loop exit
PB: predicated region body
PF: predicated region fallthrough
CT: control target
= control target key end

     0   :  { %12 = vsyncpa [#allocation3], 0  ;;  %vm137_vm0 = vcmask 64512   ;;  %s476_s0 = inlined_call_operand.vmem [shape: f32[32,128], index: 0, kind: input, shape index: {}]   ;;  %s477_s1 = inlined_call_operand.vmem [shape: s32[32,8], index: 1, kind: input, shape index: {}]   ;;  %s478_s2 = inlined_call_operand.vmem [shape: f32[8,128], index: 2, kind: input, shape index: {}]   ;;  %s479_s3 = inlined_call_operand.vmem [shape: f32[1,128], index: 3, kind: input, shape index: {}]   ;;  %s480_s4 = inlined_call_operand.vmem [shape: f32[1,128], index: 4, kind: input, shape index: {}]   ;;  %s481_s5 = inlined_call_operand.hbm [shape: f32[1,1,128], index: 5, kind: output, shape index: {0}]   ;;  %s482_s6 = inlined_call_operand.hbm [shape: f32[1,1,128], index: 6, kind: output, shape index: {1}]  }
   0x1   :  { %v102_v0 = vld [vmem:[%s478_s2] sm:$0xff]  ;;  %v100_v2 = vld [vmem:[%s477_s1 + $0x10] sm:$0xff]  ;;  %v99_v5 = vld [vmem:[%s477_s1 + $0x8] sm:$0xff] }
   0x2   :  { %v98_v1 = vld [vmem:[%s477_s1] sm:$0xff]  ;;  %338 = vmatprep.subr.mxu0 %v102_v0  ;;  %346 = vmatprep.subr.mxu1 %v102_v0  ;;  %v135_v4 = vcvt.s32.f32 %v100_v2  ;;  %v101_v6 = vld [vmem:[%s477_s1 + $0x18] sm:$0xff]  ;;  %v134_v7 = vcvt.s32.f32 %v99_v5 }
   0x3   :  { %v133_v3 = vcvt.s32.f32 %v98_v1  ;;  %339 = vmatpush3.msra.mxu0 %v102_v0  ;;  %347 = vmatpush3.msra.mxu1 %v102_v0  ;;  %v136_v8 = vcvt.s32.f32 %v101_v6 }
   0x4   :  { %13 = vsyncpa [#allocation5], 0  ;;  %343 = vmatprep.mubr.msk.f32.mxu1 %vm137_vm0, %v135_v4  ;;  %v395_v9 = vmov 0.0   ;;  %v95_v10 = vld [vmem:[%s476_s0 + $0x8] sm:$0xff]  ;;  %v332_v11 = vld [vmem:[%s480_s4] ss:$0 sm:$0xff] }
   0x5   :  { %340 = vmatprep.mubr.msk.f32.mxu0 %vm137_vm0, %v133_v3  ;;  %344 = vmatmul.mubr.msk.f32.vlgmr.msra.gmra.mxu1 %vm137_vm0, %v136_v8  ;;  %92 = vst [vmem:[#allocation2] sm:$0x1] %v395_v9  ;;  %93 = vst [vmem:[#allocation4] sm:$0x1] %v395_v9  ;;  %v94_v12 = vld [vmem:[%s476_s0] sm:$0xff]  ;;  %v96_v14 = vld [vmem:[%s476_s0 + $0x10] sm:$0xff]  ;;  %v252_v16 = vmul.f32 %v332_v11, %v95_v10 }
   0x6   :  { %341 = vmatmul.mubr.msk.f32.vlgmr.msra.gmra.mxu0 %vm137_vm0, %v134_v7  ;;  %v331_v13 = vld [vmem:[%s479_s3] ss:$0 sm:$0xff]  ;;  %v97_v17 = vld [vmem:[%s476_s0 + $0x18] sm:$0xff]  ;;  %v251_v19 = vmul.f32 %v332_v11, %v94_v12  ;;  %v253_v22 = vmul.f32 %v332_v11, %v96_v14  ;;  %s396_s0 = smov [#allocation2]   ;;  %s397_s4 = smov [#allocation4]  }
   0x7   :  { %v254_v23 = vmul.f32 %v332_v11, %v97_v17  ;;  %s293_s3 = sshll.u32 %s396_s0, 4  ;;  %s303_s17 = sshll.u32 %s397_s4, 4  ;;  %s294_s3 = int_to_ptr.vmem [resolvable:$true] %s293_s3  ;;  %s304_s17 = int_to_ptr.vmem [resolvable:$true] %s303_s17 }
   0x8   :  { %s351_s18 = scalar_lea.vmem %s294_s3, 16  ;;  %s355_s19 = scalar_lea.vmem %s294_s3, 32 }
   0x9   :  { %p352_p0 = scmp.ne.s32.totalorder %s294_s3, %s351_s18  ;;  %p356_p1 = scmp.lt.s32.totalorder %s294_s3, %s294_s3 }
   0xa   :  { %p357_p2 = scmp.lt.s32.totalorder %s355_s19, %s351_s18 }
   0xc   :  { %v263_v48 = vld [vmem:[#allocation2] sm:$0x1]  ;;  %v275_v49 = vld [vmem:[#allocation4] sm:$0x1]  ;;  %p358_p3 = por %p357_p2, %p356_p1 }
   0xe   :  { %p359_p4 = pnand %p358_p3, %p352_p0 }
  0xc5   :  { %v345_v18 = vpop.f32.mrf.mxu1 }
  0xc6   :  { %v342_v15 = vpop.f32.mrf.mxu0  ;;  %vm244_vm4 = vcmp.eq.f32.partialorder %v345_v18, %v331_v13 }
  0xc7   :  { %vm242_vm1 = vcmp.eq.f32.partialorder %v342_v15, %v331_v13  ;;  %v226_v21 = vpop.f32.mrf.mxu1  ;;  %v258_v34 = vsel %vm244_vm4, %v254_v23, 0.0  ;;  %v262_v35 = vsel %vm244_vm4, %v332_v11, 0.0 }
  0xc8   :  { %v216_v20 = vpop.f32.mrf.mxu0  ;;  %vm243_vm3 = vcmp.eq.f32.partialorder %v226_v21, %v331_v13  ;;  %v256_v24 = vsel %vm242_vm1, %v252_v16, 0.0  ;;  %v260_v25 = vsel %vm242_vm1, %v332_v11, 0.0 }
  0xc9   :  { %vm241_vm2 = vcmp.eq.f32.partialorder %v216_v20, %v331_v13  ;;  %v257_v30 = vsel %vm243_vm3, %v253_v22, 0.0  ;;  %v261_v31 = vsel %vm243_vm3, %v332_v11, 0.0 }
  0xca   :  { %v255_v26 = vsel %vm241_vm2, %v251_v19, 0.0  ;;  %v259_v27 = vsel %vm241_vm2, %v332_v11, 0.0 }
  0xcb   :  { %v264_v28 = vadd.f32 %v256_v24, %v255_v26  ;;  %v276_v29 = vadd.f32 %v260_v25, %v259_v27 }
  0xcd   :  { %v265_v32 = vadd.f32 %v264_v28, %v257_v30  ;;  %v277_v33 = vadd.f32 %v276_v29, %v261_v31 }
  0xcf   :  { %v266_v36 = vadd.f32 %v265_v32, %v258_v34  ;;  %v278_v37 = vadd.f32 %v277_v33, %v262_v35 }
  0xd1   :  { %v267_v38 = vrot.slane %v266_v36, 4  ;;  %v279_v39 = vrot.slane %v278_v37, 4 }
  0xd3   :  { %v268_v40 = vadd.f32 %v267_v38, %v266_v36  ;;  %v280_v41 = vadd.f32 %v279_v39, %v278_v37 }
  0xd5   :  { %v269_v42 = vrot.slane %v268_v40, 2  ;;  %v281_v43 = vrot.slane %v280_v41, 2 }
  0xd7   :  { %v282_v44 = vadd.f32 %v281_v43, %v280_v41  ;;  %v270_v45 = vadd.f32 %v269_v42, %v268_v40 }
  0xd9   :  { %v271_v46 = vrot.slane %v270_v45, 1  ;;  %v283_v47 = vrot.slane %v282_v44, 1 }
  0xdb   :  { %v272_v50 = vadd.f32 %v271_v46, %v270_v45  ;;  %v284_v51 = vadd.f32 %v283_v47, %v282_v44 }
  0xdd   :  { %v273_v52 = vadd.f32 %v272_v50, %v263_v48  ;;  %v285_v53 = vadd.f32 %v284_v51, %v275_v49 }
  0xdf   :  { %274 = vst [vmem:[#allocation2] sm:$0x1] %v273_v52  ;;  %286 = vst [vmem:[#allocation4] sm:$0x1] %v285_v53 }
  0xe0   :  { %362 = shalt.err (!%p359_p4)
}
  0xe1   :  { %296 = dma.vmem_to_hbm [thread:$0]  %s294_s3, 16, %s481_s5, [#allocation3]  }
  0xe2   :  { %s371_s22 = scalar_lea.vmem %s304_s17, 16  ;;  %s375_s23 = scalar_lea.vmem %s304_s17, 32 }
  0xe3   :  { %p372_p5 = scmp.ne.s32.totalorder %s304_s17, %s371_s22  ;;  %p376_p6 = scmp.lt.s32.totalorder %s304_s17, %s304_s17 }
  0xe4   :  { %p377_p7 = scmp.lt.s32.totalorder %s375_s23, %s371_s22 }
  0xe6   :  { %p378_p8 = por %p377_p7, %p376_p6 }
  0xe8   :  { %p379_p9 = pnand %p378_p8, %p372_p5 }
  0xea   :  { %382 = shalt.err (!%p379_p9)
}
  0xeb   :  { %306 = dma.vmem_to_hbm [thread:$0]  %s304_s17, 16, %s482_s6, [#allocation5]  }
  0xec   :  { %391 = dma.done.wait [#allocation3], 16  }
  0xed   :  { %392 = vsyncadd [#allocation3], 4294967280 }
  0xee   :  { %393 = dma.done.wait [#allocation5], 16  }
  0xef   :  { %394 = vsyncadd [#allocation5], 4294967280 }
  0xf0   :  { %313 = vsyncpa [#allocation3], 1 }
  0xf1   :  { %314 = vsyncpa [#allocation5], 1 }

</bundles_post_ra>
